<compile_context>
chip_gen: v7x
topology: tpu7x:2x2x1
jax: 0.10.0
libtpu: 0.0.40
codegen_flags: <defaults>
</compile_context>

<pallas_src>
import jax
import jax.numpy as jnp
from jax.experimental import pallas as pl
from jax.experimental.pallas import tpu as pltpu


# ---------------------------------------------------------------------------
# Sizing helpers (all plain Python ints, trace-time only)
# ---------------------------------------------------------------------------
def _round_up(x: int, mult: int) -> int:
    return (x + mult - 1) // mult * mult


def _sublane_multiple(dtype) -> int:
    # f32 -> 8, bf16 -> 16, int8/fp8 -> 32 (sub-32-bit dtypes pack sublanes).
    return max(8, 32 // jnp.dtype(dtype).itemsize)


def _padded_matrix_bytes(h: int, w: int, dtype) -> int:
    """VMEM footprint of one (h, w) matrix in (sublane, lane) vreg tiles."""
    isz = jnp.dtype(dtype).itemsize
    return _round_up(h, _sublane_multiple(dtype)) * _round_up(w, 128) * isz


def _vmem_capacity_bytes() -> int:
    try:
        return int(pltpu.get_tpu_info().vmem_capacity_bytes)
    except Exception:
        return 64 << 20  # conservative: v7x per-core VMEM


def _default_budgets():
    cap = _vmem_capacity_bytes()
    # Batched path keeps 4x block (double-buffered in+out) << capacity.
    batched = max(1 << 20, min(8 << 20, cap // 8))
    # Tiled paths keep 6x tile (A, B double-buffered + scratch/out) << capacity.
    tiled = max(128 * 128 * 4, min(4 << 20, cap // 16))
    return batched, tiled


def _largest_dividing_tile(h: int, isz: int, budget: int):
    """Largest multiple-of-128 divisor of h whose (t, t) tile fits `budget`."""
    best = None
    t = 128
    while t <= h and t * t * isz <= budget:
        if h % t == 0:
            best = t
        t += 128
    return best


def _largest_fitting_tile(isz: int, budget: int) -> int:
    """Largest multiple of 128 whose (t, t) tile fits `budget` (>= 128)."""
    t = 128
    while (t + 128) * (t + 128) * isz <= budget:
        t += 128
    return t


# Below this tile size the ~0.35 us/step overhead of the triangular kernel
# outweighs its 1.5x HBM-traffic saving (worst case: v7x at ~3.2 TB/s).
_MIN_TRI_TILE = 384


# ---------------------------------------------------------------------------
# Path 1: channel-batched whole matrices (small / medium H=W)
# ---------------------------------------------------------------------------
def _sym_batched_kernel(x_ref, o_ref):
    # x_ref / o_ref view a (tc, H, W) block of whole square matrices.
    # Block is 3-D -> swapaxes (x.T would reverse ALL axes).
    x = x_ref[...]
    o_ref[...] = ((x + jnp.swapaxes(x, -1, -2)) * 0.5).astype(o_ref.dtype)


def _symmetrize_batched(xm: jax.Array, tc: int) -> jax.Array:
    m, h, w = xm.shape
    isz = jnp.dtype(xm.dtype).itemsize
    padded_block = tc * _padded_matrix_bytes(h, w, xm.dtype)
    # Double-buffered input + double-buffered output + headroom.
    vmem_limit = 4 * padded_block + (4 << 20)

    spec = pl.BlockSpec((tc, h, w), lambda i: (i, 0, 0))
    return pl.pallas_call(
        _sym_batched_kernel,
        out_shape=jax.ShapeDtypeStruct((m, h, w), xm.dtype),
        grid_spec=pltpu.PrefetchScalarGridSpec(
            num_scalar_prefetch=0,
            grid=(pl.cdiv(m, tc),),          # masked trailing block if tc !| m
            in_specs=[spec],
            out_specs=spec,
        ),
        compiler_params=pltpu.CompilerParams(
            dimension_semantics=("parallel",),
            vmem_limit_bytes=vmem_limit,
        ),
        cost_estimate=pl.CostEstimate(
            flops=2 * m * h * w,
            transcendentals=0,
            bytes_accessed=2 * m * h * w * isz,
        ),
    )(xm)


# ---------------------------------------------------------------------------
# Path 2: triangular tiling, 2x HBM traffic (large H=W, T divides H)
# ---------------------------------------------------------------------------
def _symmetrize_triangular(xm: jax.Array, t: int) -> jax.Array:
    m, h, w = xm.shape
    isz = jnp.dtype(xm.dtype).itemsize
    nt = h // t
    npairs = nt * (nt + 1) // 2

    # Upper-triangular (i, j) pair list, scalar-prefetched into SMEM.
    ii_list, jj_list = [], []
    for i in range(nt):
        for j in range(i, nt):
            ii_list.append(i)
            jj_list.append(j)
    ii = jnp.asarray(ii_list, dtype=jnp.int32)
    jj = jnp.asarray(jj_list, dtype=jnp.int32)

    def a_map(g, ii_ref, jj_ref):
        return (g // npairs, ii_ref[g % npairs], jj_ref[g % npairs])

    def b_map(g, ii_ref, jj_ref):
        return (g // npairs, jj_ref[g % npairs], ii_ref[g % npairs])

    def kernel(ii_ref, jj_ref, a_ref, b_ref, o_ref, u_buf, l_buf, sem):
        g = pl.program_id(0)
        b = g // npairs
        p = g % npairs
        i = ii_ref[p]
        j = jj_ref[p]

        a = a_ref[...]
        bm = b_ref[...]

        # Upper tile out[i, j] = (A + B^T) / 2 ; manual DMA to the HBM output.
        u_buf[...] = ((a + jnp.swapaxes(bm, -1, -2)) * 0.5).astype(u_buf.dtype)
        cp_u = pltpu.make_async_copy(
            u_buf, o_ref.at[b, pl.ds(i * t, t), pl.ds(j * t, t)], sem.at[0])
        cp_u.start()

        # Mirrored lower tile out[j, i] = (B + A^T) / 2 (skip on the diagonal).
        @pl.when(i != j)
        def _():
            l_buf[...] = ((bm + jnp.swapaxes(a, -1, -2)) * 0.5).astype(l_buf.dtype)
            cp_l = pltpu.make_async_copy(
                l_buf, o_ref.at[b, pl.ds(j * t, t), pl.ds(i * t, t)], sem.at[1])
            cp_l.start()
            cp_l.wait()

        cp_u.wait()

    tile_bytes = t * t * isz
    # 2 inputs double-buffered (4 tiles) + 2 scratch tiles + headroom.
    vmem_limit = 6 * tile_bytes + (4 << 20)

    return pl.pallas_call(
        kernel,
        out_shape=jax.ShapeDtypeStruct((m, h, w), xm.dtype),
        grid_spec=pltpu.PrefetchScalarGridSpec(
            num_scalar_prefetch=2,
            grid=(m * npairs,),                 # flattened -> shards on megacore
            in_specs=[pl.BlockSpec((pl.Squeezed(), t, t), a_map),
                      pl.BlockSpec((pl.Squeezed(), t, t), b_map)],
            out_specs=pl.BlockSpec(memory_space=pl.ANY),   # written via DMA
            scratch_shapes=[pltpu.VMEM((t, t), xm.dtype),
                            pltpu.VMEM((t, t), xm.dtype),
                            pltpu.SemaphoreType.DMA((2,))],
        ),
        compiler_params=pltpu.CompilerParams(
            dimension_semantics=("parallel",),
            vmem_limit_bytes=vmem_limit,
        ),
        cost_estimate=pl.CostEstimate(
            flops=2 * m * h * w,
            transcendentals=0,
            # reads: h*w + nt*t*t (diagonal tiles read twice); writes: h*w.
            bytes_accessed=(2 * m * h * w + m * nt * t * t) * isz,
        ),
    )(ii, jj, xm, xm)


# ---------------------------------------------------------------------------
# Path 3: mirrored two-input tiling, cdiv grid (large H=W, no clean divisor)
# ---------------------------------------------------------------------------
def _sym_mirrored_kernel(a_ref, b_ref, o_ref):
    # a_ref: tile of x at (i, j); b_ref: mirrored tile at (j, i).
    o_ref[...] = ((a_ref[...] + jnp.swapaxes(b_ref[...], -1, -2)) * 0.5
                  ).astype(o_ref.dtype)


def _symmetrize_mirrored(xm: jax.Array, t: int) -> jax.Array:
    m, h, w = xm.shape
    isz = jnp.dtype(xm.dtype).itemsize
    nti = pl.cdiv(h, t)
    ntj = pl.cdiv(w, t)

    def a_map(g, jb):
        return (g // nti, g % nti, jb)

    def b_map(g, jb):
        return (g // nti, jb, g % nti)

    spec_a = pl.BlockSpec((pl.Squeezed(), t, t), a_map)
    spec_b = pl.BlockSpec((pl.Squeezed(), t, t), b_map)
    out_spec = pl.BlockSpec((pl.Squeezed(), t, t), a_map)

    return pl.pallas_call(
        _sym_mirrored_kernel,
        out_shape=jax.ShapeDtypeStruct((m, h, w), xm.dtype),
        grid_spec=pltpu.PrefetchScalarGridSpec(
            num_scalar_prefetch=0,
            grid=(m * nti, ntj),                # edge blocks masked by Pallas
            in_specs=[spec_a, spec_b],
            out_specs=out_spec,
        ),
        compiler_params=pltpu.CompilerParams(
            dimension_semantics=("parallel", "parallel"),
            vmem_limit_bytes=6 * t * t * isz + (4 << 20),
        ),
        cost_estimate=pl.CostEstimate(
            flops=2 * m * h * w,
            transcendentals=0,
            bytes_accessed=3 * m * h * w * isz,   # mirrored tile re-read
        ),
    )(xm, xm)


# ---------------------------------------------------------------------------
# Public entry point
# ---------------------------------------------------------------------------
def symmetrize(x: jax.Array, *, batched_block_bytes=None,
               tiled_block_bytes=None) -> jax.Array:
    """Pallas equivalent of Symmetrize.forward for NCHW input with H == W."""
    n, c, h, w = x.shape
    assert h == w, "Symmetrize expects a square matrix in the last two dims"

    isz = jnp.dtype(x.dtype).itemsize
    m = n * c
    xm = x.reshape(m, h, w)  # free metadata reshape (contiguous)

    auto_batched, auto_tiled = _default_budgets()
    batched_budget = auto_batched if batched_block_bytes is None else int(batched_block_bytes)
    tiled_budget = auto_tiled if tiled_block_bytes is None else int(tiled_block_bytes)
    tiled_budget = max(tiled_budget, 128 * 128 * isz)

    padded_mat = _padded_matrix_bytes(h, w, x.dtype)

    if padded_mat <= batched_budget:
        # Whole-matrix channel-batched path (block sized on PADDED bytes).
        tc = max(1, min(m, batched_budget // padded_mat))
        # Keep >= ~4 grid steps when possible so pipelining / megacore engage.
        tc = max(1, min(tc, pl.cdiv(m, min(m, 4))))
        out = _symmetrize_batched(xm, tc)
    else:
        # Large matrices: tile the (H, W) plane.
        t_div = _largest_dividing_tile(h, isz, tiled_budget)
        if t_div is not None and t_div >= _MIN_TRI_TILE:
            out = _symmetrize_triangular(xm, t_div)   # 2x-traffic path
        else:
            t = _largest_fitting_tile(isz, tiled_budget)
            t = min(t, _round_up(h, 128))
            out = _symmetrize_mirrored(xm, t)         # cdiv / edge-masked path

    return out.reshape(n, c, h, w)


# ---------------------------------------------------------------------------
# Self-test
# ---------------------------------------------------------------------------
if __name__ == "__main__":
    def ref_sym(a):
        return (a + jnp.transpose(a, (0, 1, 3, 2))) / 2

    # 1) Module-sized input (2, 4, 16, 16): batched whole-matrix path.
    x1 = jax.random.normal(jax.random.PRNGKey(0), (2, 4, 16, 16), dtype=jnp.float32)
    o1 = jax.block_until_ready(symmetrize(x1))
    assert o1.shape == x1.shape and o1.dtype == x1.dtype
    assert jnp.allclose(o1, ref_sym(x1), atol=1e-6)
    assert jnp.allclose(o1, jnp.transpose(o1, (0, 1, 3, 2)), atol=1e-6)

    # 2) Batched path with a partial (masked) trailing block: m=15, tc=4.
    x2 = jax.random.normal(jax.random.PRNGKey(0), (3, 5, 16, 16), dtype=jnp.float32)
    o2 = jax.block_until_ready(symmetrize(x2, batched_block_bytes=32 * 1024))
    assert jnp.allclose(o2, ref_sym(x2), atol=1e-6)

    # 3) bf16 batched path (different sublane packing).
    x3 = jax.random.normal(jax.random.PRNGKey(0), (2, 4, 16, 16)).astype(jnp.bfloat16)
    o3 = jax.block_until_ready(symmetrize(x3))
    assert o3.dtype == jnp.bfloat16
    assert jnp.allclose(o3.astype(jnp.float32),
                        ref_sym(x3.astype(jnp.float32)), atol=5e-2)

    # 4) Triangular 2x-traffic tiled path (forced): 768x768 -> t=384, 3 pairs.
    x4 = jax.random.normal(jax.random.PRNGKey(0), (1, 1, 768, 768), dtype=jnp.float32)
    o4 = jax.block_until_ready(
        symmetrize(x4, batched_block_bytes=1 << 20, tiled_block_bytes=1 << 20))
    assert jnp.allclose(o4, ref_sym(x4), atol=1e-6)
    assert jnp.allclose(o4, jnp.transpose(o4, (0, 1, 3, 2)), atol=1e-6)

    # 5) Mirrored cdiv fallback with edge masking: 320x320 -> t=128, 3x3 blocks.
    x5 = jax.random.normal(jax.random.PRNGKey(0), (1, 2, 320, 320), dtype=jnp.float32)
    o5 = jax.block_until_ready(
        symmetrize(x5, batched_block_bytes=64 * 1024, tiled_block_bytes=64 * 1024))
    assert jnp.allclose(o5, ref_sym(x5), atol=1e-6)
    assert jnp.allclose(o5, jnp.transpose(o5, (0, 1, 3, 2)), atol=1e-6)

    print("KERNEL_OK")
</pallas_src>

<mosaic_0001>
module attributes {stable_mosaic.version = 11 : i64} {
  func.func @_sym_batched_kernel(%arg0: i32, %arg1: memref<2x16x16xf32, #tpu.memory_space<vmem>>, %arg2: memref<2x16x16xf32, #tpu.memory_space<vmem>>) attributes {dimension_semantics = [#tpu.dimension_semantics<parallel>], iteration_bounds = array<i64: 4>, scalar_prefetch = 0 : i64, scratch_operands = 0 : i64, tpu.core_type = #tpu.core_type<tc>, window_params = [{transform_indices = @transform_0, window_bounds = array<i64: 2, 16, 16>}, {transform_indices = @transform_1, window_bounds = array<i64: 2, 16, 16>}]} {
    %c0 = arith.constant 0 : index
    %c0_0 = arith.constant 0 : index
    %c0_1 = arith.constant 0 : index
    %0 = vector.load %arg1[%c0, %c0_0, %c0_1] : memref<2x16x16xf32, #tpu.memory_space<vmem>>, vector<2x16x16xf32>
    %1 = tpu.transpose %0, [0, 2, 1] : vector<2x16x16xf32> -> vector<2x16x16xf32>
    %2 = arith.addf %0, %1 : vector<2x16x16xf32>
    %cst = arith.constant 5.000000e-01 : f32
    %3 = vector.broadcast %cst : f32 to vector<2x16x16xf32>
    %4 = arith.mulf %2, %3 : vector<2x16x16xf32>
    %c0_2 = arith.constant 0 : index
    %c0_3 = arith.constant 0 : index
    %c0_4 = arith.constant 0 : index
    %5 = vector.load %arg2[%c0_2, %c0_3, %c0_4] : memref<2x16x16xf32, #tpu.memory_space<vmem>>, vector<2x16x16xf32>
    tpu.vector_store %arg2[%c0_2, %c0_3, %c0_4], %4 {strides = array<i32>} : memref<2x16x16xf32, #tpu.memory_space<vmem>>, vector<2x16x16xf32>,
    return
  }
  func.func @transform_0(%arg0: i32) -> (i32, i32, i32) {
    %c0_i32 = arith.constant 0 : i32
    %c0_i32_0 = arith.constant 0 : i32
    %c0_i32_1 = arith.constant 0 : i32
    return %arg0, %c0_i32, %c0_i32_0 : i32, i32, i32
  }
  func.func @transform_1(%arg0: i32) -> (i32, i32, i32) {
    %c0_i32 = arith.constant 0 : i32
    %c0_i32_0 = arith.constant 0 : i32
    %c0_i32_1 = arith.constant 0 : i32
    return %arg0, %c0_i32, %c0_i32_0 : i32, i32, i32
  }
}

</mosaic_0001>

<bundles_post_ra>
// kernel: tpu_custom_call.1
= control target key start
LH: loop header
LB: loop body
LE: loop exit
PB: predicated region body
PF: predicated region fallthrough
CT: control target
= control target key end

     0   :  { %6 = vsyncpa [#allocation3], 0  ;;  %s656_s0 = inlined_call_operand.hbm [shape: f32[8,16,16], index: 0, kind: input, shape index: {}]   ;;  %s657_s1 = inlined_call_operand.hbm [shape: f32[8,16,16], index: 1, kind: output, shape index: {}]  }
   0x1   :  { %8 = vsyncpa [#allocation3 + $0x1], 0 }
   0x2   :  { %9 = vsyncpa [#allocation4], 0 }
   0x3   :  { %11 = vsyncpa [#allocation4 + $0x1], 0  ;;  %s492_s6 = smov 0   ;;  %s494_s7 = smov 0  }
   0x4   :  { %s496_s8 = smov 0   ;;  %s498_s9 = smov 0  }
   0x5 LB: > { %s513_s10 = sadd.s32 4294967295, %s474_s9   ;;  %s307_s11 = sadd.s32 4294967294, %s474_s9   ;;  %s474_s9 = sphi %s498_s9, %s669_s9   ;;  %s470_s8 = sphi %s496_s8, %s668_s8   ;;  %s466_s7 = sphi %s494_s7, %s667_s7   ;;  %s462_s6 = sphi %s492_s6, %s666_s6  }
   0x6   : > { %s517_s12 = sadd.s32 1, %s474_s9   ;;  %s24_s13 = sadd.s32 1, %s470_s8 }
   0x7   : > { %s21_s14 = ssub.s32 %s474_s9, %s517_s12  ;;  %p31_p0 = scmp.ne.s32.totalorder %s470_s8, %s466_s7 }
   0x8   : > { %p22_p1 = scmp.eq.s32.totalorder %s21_s14, 0  ;;  %p32_p2 = scmp.eq.s32.totalorder %s474_s9, 0 }
   0x9   : > { %p37_p3 = scmp.ne.s32.totalorder %s466_s7, %s462_s6  ;;  %p38_p4 = scmp.eq.s32.totalorder %s513_s10, 0 }
   0xa   : > { %s529_s15 = scalar_select %p22_p1, %s470_s8, %s24_s13  }
   0xb   : > { %p531_p5 = por %p32_p2, %p31_p0  ;;  %p535_p6 = por %p38_p4, %p37_p3 }
   0xc   : > { %p61_p7 = scmp.eq.s32.totalorder %s513_s10, 3  ;;  %p67_p8 = scmp.eq.s32.totalorder %s307_s11, 3 }
   0xd   : > { %p339_p9 = scmp.lt.s32.totalorder %s474_s9, 4  ;;  %s87_s20 = sand.u32 1, %s470_s8  }
   0xe   : > { %p541_p10 = por %p61_p7, %p31_p0  ;;  %p545_p11 = por %p67_p8, %p37_p3 }
   0xf   : > { %s324_s21 = sshll.u32 %s474_s9, 9  ;;  %s310_s22 = sshll.u32 %s87_s20, 5 }
  0x10   : > { %s661_s18 = scalar_select %p541_p10, 1, 0 }
  0x11   : > { %s662_s19 = scalar_select %p545_p11, 1, 0 }
  0x12   : > { %s554_s25 = scalar_lea.hbm %s656_s0, %s324_s21  ;;  %s91_s26 = scalar_lea.vmem [#allocation2], %s310_s22 }
  0x13   : > { %s99_s27 = sshll.u32 %s91_s26, 4  ;;  %p558_p12 = pnand %p339_p9, %p531_p5  ;;  %s562_s27 = int_to_ptr.vmem [resolvable:$true] %s99_s27 }
  0x14   : > { %s564_s29 = scalar_lea.sflag [#allocation3], %s87_s20  ;;  %s378_s30 = scalar_lea.hbm %s554_s25, 512 }
  0x15   : > { %p379_p13 = scmp.ne.s32.totalorder %s554_s25, %s378_s30  ;;  %p380_p0 = pneg %p558_p12 }
  0x16   : > { %s383_s4 = scalar_lea.hbm %s656_s0, 2048  ;;  %p384_p3 = scmp.lt.u32.totalorder %s554_s25, %s656_s0 }
  0x17   : > { %p381_p1 = pnand %p380_p0, %p379_p13  ;;  %p385_p4 = scmp.lt.u32.totalorder %s383_s4, %s378_s30 }
  0x18   : > { %p387_p7 = scmp.lt.u32.totalorder %s378_s30, %s554_s25 }
  0x19   : > { %p382_p2 = pneg %p381_p1  ;;  %p386_p5 = por %p385_p4, %p384_p3 }
  0x1b   : > { %p388_p8 = por %p387_p7, %p386_p5 }
  0x1d   : > { %p389_p9 = pnand %p388_p8, %p382_p2 }
  0x1f   : > { %392 = shalt.err (!%p389_p9)
}
  0x20   : > { %s393_s13 = scalar_lea.vmem %s562_s27, 512  ;;  %s476_s14 = smov [#allocation2]  }
  0x21   : > { %p394_p13 = scmp.ne.s32.totalorder %s562_s27, %s393_s13  ;;  %s398_s16 = sshll.u32 %s476_s14, 4  ;;  %s399_s16 = int_to_ptr.vmem [resolvable:$false] %s398_s16 }
  0x22   : > { %s400_s20 = scalar_lea.vmem %s399_s16, 1024  ;;  %p401_p10 = scmp.lt.s32.totalorder %s562_s27, %s399_s16 }
  0x23   : > { %p396_p1 = pnand %p394_p13, %p380_p0  ;;  %p402_p3 = scmp.lt.s32.totalorder %s400_s20, %s393_s13 }
  0x25   : > { %p397_p11 = pneg %p396_p1  ;;  %p403_p4 = por %p402_p3, %p401_p10 }
  0x27   : > { %p404_p5 = pnand %p403_p4, %p397_p11 }
  0x29   : > { %407 = shalt.err (!%p404_p5)
}
  0x2a   : > { %s477_s21 = smov 128   ;;  %s478_s22 = smov 8  }
  0x2b   : > { %334 = dma.hbm_to_vmem [thread:$0]  (!%p558_p12), %s554_s25, 512, %s562_s27, %s564_s29, %s477_s21, %s477_s21, %s478_s22  }
  0x2c   : > { %p314_p0 = scmp.ge.s32.totalorder %s474_s9, 1  ;;  %p107_p2 = scmp.lt.s32.totalorder %s474_s9, 5 }
  0x2e   : > { %p108_p7 = pnand %p314_p0, %p107_p2 }
  0x2f   : > { %s595_s23 = sand.u32 (!%p108_p7), 1, %s466_s7  }
  0x30   : > { %111 = sbr.rel (%p108_p7) target bundleno = 209 (0xd1), region = 24  ;;  %s315_s24 = sshll.u32 (!%p108_p7), %s595_s23, 5 }
  0x31   : > { %s114_s26 = scalar_lea.sflag (!%p108_p7), [#allocation3], %s595_s23  ;;  %s117_s30 = scalar_lea.vmem (!%p108_p7), [#allocation2], %s315_s24 }
  0x37   : > { %453 = dma.done.wait (%p535_p6), %s114_s26, 512  }
  0x38   : > { %455 = vsyncadd (%p535_p6), %s114_s26, 4294966784  ;;  %v140_v0 = vld [vmem:[%s117_s30 + $0x10] sm:$0xff]  ;;  %v138_v1 = vld [vmem:[%s117_s30] sm:$0xff]  ;;  %vm214_vm0 = vcmask 130048   ;;  %s135_s25 = scalar_lea.vmem [#allocation5], %s315_s24  ;;  %s326_s17 = sshll.u32 %s513_s10, 9 }
  0x39   : > { %174 = vxpose.xlu1.b32.start [1/2] (short) (narrow) %v140_v0, 16  ;;  %142 = vxpose.xlu0.b32.start [1/2] (short) (narrow) %v138_v1, 16  ;;  %v141_v2 = vld [vmem:[%s117_s30 + $0x18] sm:$0xff]  ;;  %v139_v3 = vld [vmem:[%s117_s30 + $0x8] sm:$0xff]  ;;  %s234_s27 = sshll.u32 %s135_s25, 4  ;;  %s611_s2 = scalar_lea.hbm %s657_s1, %s326_s17  ;;  %s604_s27 = int_to_ptr.vmem [resolvable:$true] %s234_s27 }
  0x3a   : > { %s220_s10 = scalar_lea.sflag [#allocation4], %s595_s23  ;;  %s408_s3 = scalar_lea.vmem %s604_s27, 512 }
  0x3b   : > { %p409_p6 = scmp.ne.s32.totalorder %s604_s27, %s408_s3  ;;  %p664_p10 = scmp.ne.s32.totalorder %s661_s18, 0 }
  0x3c   : > { %s479_s4 = smov [#allocation5]  }
  0x3d   : > { %175 = vxpose.xlu1.b32.end [2/2] (short) (narrow) %v141_v2, 16  ;;  %143 = vxpose.xlu0.b32.end [2/2] (short) (narrow) %v139_v3, 16  ;;  %p410_p11 = pnand %p409_p6, %p664_p10  ;;  %s412_s5 = sshll.u32 %s479_s4, 4  ;;  %s413_s5 = int_to_ptr.vmem [resolvable:$false] %s412_s5 }
  0x3e   : > { %s414_s11 = scalar_lea.vmem %s413_s5, 1024  ;;  %p415_p8 = scmp.lt.s32.totalorder %s604_s27, %s413_s5 }
  0x3f   : > { %p411_p12 = pneg %p410_p11  ;;  %p416_p9 = scmp.lt.s32.totalorder %s414_s11, %s408_s3 }
  0x41   : > { %p417_p13 = por %p416_p9, %p415_p8 }
  0x43   : > { %p418_p1 = pnand %p417_p13, %p411_p12 }
  0xb9   : > { %v190_v4 = vpop.trf.xlu1  ;;  %v158_v5 = vpop.trf.xlu0 }
  0xba   : > { %v208_v6 = vadd.f32 %v190_v4, %v140_v0  ;;  %v206_v7 = vadd.f32 %v158_v5, %v138_v1 }
  0xbc   : > { %v212_v8 = vmul.f32 0.5, %v208_v6  ;;  %v210_v9 = vmul.f32 0.5, %v206_v7 }
  0xbd   : > { %v191_v10 = vpop.trf.xlu1  ;;  %v159_v11 = vpop.trf.xlu0 }
  0xbe   : > { %217 = vst.msk [vmem:[%s135_s25 + $0x10] sm:$0xff] %vm214_vm0, %v212_v8  ;;  %215 = vst.msk [vmem:[%s135_s25] sm:$0xff] %vm214_vm0, %v210_v9  ;;  %v209_v12 = vadd.f32 %v191_v10, %v141_v2  ;;  %v207_v13 = vadd.f32 %v159_v11, %v139_v3 }
  0xc0   : > { %v213_v14 = vmul.f32 0.5, %v209_v12  ;;  %v211_v15 = vmul.f32 0.5, %v207_v13 }
  0xc2   : > { %218 = vst.msk [vmem:[%s135_s25 + $0x18] sm:$0xff] %vm214_vm0, %v213_v14  ;;  %216 = vst.msk [vmem:[%s135_s25 + $0x8] sm:$0xff] %vm214_vm0, %v211_v15 }
  0xc3   : > { %421 = shalt.err (!%p418_p1)
}
  0xc4   : > { %s422_s13 = scalar_lea.hbm %s611_s2, 512  ;;  %s426_s20 = scalar_lea.hbm %s657_s1, 2048 }
  0xc5   : > { %p423_p3 = scmp.ne.s32.totalorder %s611_s2, %s422_s13  ;;  %p427_p0 = scmp.lt.u32.totalorder %s611_s2, %s657_s1 }
  0xc6   : > { %p428_p2 = scmp.lt.u32.totalorder %s426_s20, %s422_s13  ;;  %p430_p6 = scmp.lt.u32.totalorder %s422_s13, %s611_s2 }
  0xc7   : > { %p424_p4 = pnand %p423_p3, %p664_p10 }
  0xc8   : > { %p429_p7 = por %p428_p2, %p427_p0 }
  0xc9   : > { %p425_p5 = pneg %p424_p4 }
  0xca   : > { %p431_p11 = por %p430_p6, %p429_p7 }
  0xcc   : > { %p432_p12 = pnand %p431_p11, %p425_p5 }
  0xce   : > { %435 = shalt.err (!%p432_p12)
}
  0xcf   : > { %s480_s24 = smov 128   ;;  %s481_s26 = smov 8  }
  0xd0   : > { %329 = dma.vmem_to_hbm [thread:$0]  (%p664_p10), %s604_s27, 512, %s611_s2, %s220_s10, %s480_s24, %s480_s24, %s481_s26  }
  0xd1 PF: > { %p340_p8 = scmp.ge.s32.totalorder %s474_s9, 2  ;;  %s249_s30 = sand.u32 1, %s462_s6  }
  0xd2   : > { %p665_p9 = scmp.ne.s32.totalorder %s662_s19, 0  ;;  %s250_s25 = scalar_lea.sflag [#allocation4], %s249_s30 }
  0xd4   : > { %p336_p13 = pnand %p340_p8, %p665_p9 }
  0xd6   : > { %457 = dma.done.wait (!%p336_p13), %s250_s25, 512  }
  0xd7   : > { %459 = vsyncadd (!%p336_p13), %s250_s25, 4294966784  ;;  %p14_p1 = scmp.ge.s32.totalorder %s517_s12, 6   ;;  %s666_s6 = smov %s466_s7 }
  0xd8   : > { %s667_s7 = smov %s470_s8  ;;  %s668_s8 = smov %s529_s15 }
  0xd9   : > { %s669_s9 = smov %s517_s12  ;;  %16 = sbr.rel (!%p14_p1) target bundleno = 5 (0x5), region = 69 }
  0xe0   :  { %255 = vsyncpa [#allocation3], 1 }
  0xe1   :  { %257 = vsyncpa [#allocation3 + $0x1], 1 }
  0xe2   :  { %258 = vsyncpa [#allocation4], 1 }
  0xe3   :  { %260 = vsyncpa [#allocation4 + $0x1], 1 }

</bundles_post_ra>
